<compile_context>
chip_gen: v7x
topology: tpu7x:2x2x1
jax: 0.10.0
libtpu: 0.0.40
codegen_flags: <defaults>
</compile_context>

<pallas_src>
import functools

import jax
import jax.numpy as jnp
from jax import lax
from jax.experimental import pallas as pl
from jax.experimental.pallas import tpu as pltpu


def _round_up(x, m):
    return (x + m - 1) // m * m


def _lstm_chunk_kernel(maxlen_ref, pg_ref, len_ref, wh_ref, out_ref,
                       h_ref, c_ref, *, t_chunk, hid):
    """Processes T_CHUNK LSTM time steps per grid step (grid axis 0 = time)."""
    chunk = pl.program_id(0)
    t0 = chunk * t_chunk

    @pl.when(chunk == 0)
    def _init():
        h_ref[...] = jnp.zeros_like(h_ref)
        c_ref[...] = jnp.zeros_like(c_ref)

    # Skip chunks where every sequence has already finished (heavy padding).
    @pl.when(t0 < maxlen_ref[0])
    def _compute():
        lens = len_ref[...]                       # (B, 1) int32
        wh = wh_ref[...]                          # (H, 4H) bf16, VMEM-resident

        def step(s, carry):
            h, c = carry                          # f32 (B, H) each
            # Pre-computed x_t @ W_ih^T + bias, streamed in bf16.
            pre = pg_ref[s].astype(jnp.float32)   # (B, 4H)
            gates = pre + jnp.dot(h.astype(jnp.bfloat16), wh,
                                  preferred_element_type=jnp.float32)
            i_g = jax.nn.sigmoid(gates[:, 0 * hid:1 * hid])
            f_g = jax.nn.sigmoid(gates[:, 1 * hid:2 * hid])
            g_g = jnp.tanh(gates[:, 2 * hid:3 * hid])
            o_g = jax.nn.sigmoid(gates[:, 3 * hid:4 * hid])
            c_new = f_g * c + i_g * g_g
            h_new = o_g * jnp.tanh(c_new)
            # pack_padded_sequence: steps with t >= lengths[b] freeze the state,
            # so the final h already equals h at step lengths[b]-1 per row.
            valid = (t0 + s) < lens               # (B, 1) bool
            return (jnp.where(valid, h_new, h), jnp.where(valid, c_new, c))

        h, c = lax.fori_loop(0, t_chunk, step, (h_ref[...], c_ref[...]),
                             unroll=True)
        h_ref[...] = h
        c_ref[...] = c

    @pl.when(chunk == pl.num_programs(0) - 1)
    def _finalize():
        out_ref[...] = h_ref[...]


def uni_lstm_forward(indices, lengths, embedding_table, w_ih, w_hh, b_ih, b_hh,
                     *, t_chunk=4):
    """indices: (B, S) int32, lengths: (B,) int32, table: (V, D) f32,
    w_ih: (4H, D), w_hh: (4H, H), b_ih/b_hh: (4H,).  Returns (B, H) f32."""
    B, S = indices.shape
    H = w_hh.shape[1]

    B_pad = _round_up(max(B, 8), 8)
    S_pad = _round_up(S, t_chunk)
    n_chunks = S_pad // t_chunk

    # ---- Input projection hoisted out of the recurrence (no sequential dep).
    # Gather only the B*S referenced embedding rows; one large MXU matmul.
    emb = jnp.take(embedding_table, indices.reshape(-1), axis=0)       # (B*S, D)
    bias = (b_ih + b_hh).astype(jnp.float32)                           # (4H,)
    pre = jnp.dot(emb.astype(jnp.bfloat16),
                  jnp.transpose(w_ih).astype(jnp.bfloat16),
                  preferred_element_type=jnp.float32) + bias           # (B*S, 4H)
    pre = pre.reshape(B, S, 4 * H).transpose(1, 0, 2)                  # time-major (S, B, 4H)
    # Pad batch to a sublane multiple and time to a chunk multiple; padded
    # rows/steps are frozen by the length mask and sliced off at the end.
    pre = jnp.pad(pre, ((0, S_pad - S), (0, B_pad - B), (0, 0)))
    pre = pre.astype(jnp.bfloat16)                                     # streamed slab

    wh = jnp.transpose(w_hh).astype(jnp.bfloat16)                      # (H, 4H) resident
    lengths_i32 = lengths.astype(jnp.int32)
    lens_2d = jnp.pad(lengths_i32, (0, B_pad - B)).reshape(B_pad, 1)
    max_len = jnp.max(lengths_i32).reshape(1)                          # scalar prefetch

    # ---- VMEM budget derived from the actual resident footprint.
    vmem_bytes = (
        2 * t_chunk * B_pad * 4 * H * 2     # pre-gate slab, double-buffered, bf16
        + 2 * H * 4 * H * 2                 # W_hh^T (default 2 buffers), bf16
        + 2 * B_pad * 128 * 4               # lengths tile (lane-padded)
        + 2 * B_pad * H * 4                 # output block
        + 2 * B_pad * H * 4                 # h / c scratch
    )
    vmem_limit = int(min(100 * 1024 * 1024, max(32 * 1024 * 1024, 2 * vmem_bytes)))

    grid_spec = pltpu.PrefetchScalarGridSpec(
        num_scalar_prefetch=1,              # max_len -> SMEM
        grid=(n_chunks,),
        in_specs=[
            # streamed pre-gate chunk (double-buffered by BlockSpec pipelining)
            pl.BlockSpec((t_chunk, B_pad, 4 * H), lambda c, ml: (c, 0, 0)),
            # grid-invariant (VMEM-resident) blocks
            pl.BlockSpec((B_pad, 1), lambda c, ml: (0, 0)),             # lengths
            pl.BlockSpec((H, 4 * H), lambda c, ml: (0, 0)),             # W_hh^T
        ],
        out_specs=pl.BlockSpec((B_pad, H), lambda c, ml: (0, 0)),
        scratch_shapes=[
            pltpu.VMEM((B_pad, H), jnp.float32),                        # h state
            pltpu.VMEM((B_pad, H), jnp.float32),                        # c state
        ],
    )

    kernel = functools.partial(_lstm_chunk_kernel, t_chunk=t_chunk, hid=H)
    out = pl.pallas_call(
        kernel,
        out_shape=jax.ShapeDtypeStruct((B_pad, H), jnp.float32),
        grid_spec=grid_spec,
        compiler_params=pltpu.CompilerParams(
            dimension_semantics=("arbitrary",),   # true recurrence: sequential
            vmem_limit_bytes=vmem_limit,
        ),
    )(max_len, pre, lens_2d, wh)
    return out[:B]


def uni_lstm_reference(indices, lengths, embedding_table, w_ih, w_hh, b_ih, b_hh):
    """Pure-JAX f32 reference mirroring PyTorch packed-sequence LSTM semantics."""
    B, S = indices.shape
    H = w_hh.shape[1]
    emb = jnp.take(embedding_table, indices.reshape(-1), axis=0).reshape(B, S, -1)
    h = jnp.zeros((B, H), jnp.float32)
    c = jnp.zeros((B, H), jnp.float32)
    for t in range(S):
        x_t = emb[:, t, :]
        gates = x_t @ w_ih.T + h @ w_hh.T + b_ih + b_hh
        i_g = jax.nn.sigmoid(gates[:, 0 * H:1 * H])
        f_g = jax.nn.sigmoid(gates[:, 1 * H:2 * H])
        g_g = jnp.tanh(gates[:, 2 * H:3 * H])
        o_g = jax.nn.sigmoid(gates[:, 3 * H:4 * H])
        c_new = f_g * c + i_g * g_g
        h_new = o_g * jnp.tanh(c_new)
        valid = t < lengths.reshape(B, 1)
        h = jnp.where(valid, h_new, h)
        c = jnp.where(valid, c_new, c)
    return h


if __name__ == "__main__":
    key = jax.random.PRNGKey(0)
    k_tab, k_idx, k_len, k_wi, k_wh, k_bi, k_bh = jax.random.split(key, 7)

    # Small demo shapes consistent with the module (input_dim=300; hid_dim is
    # 2048 in production, kept lane-aligned and small here).
    B, S, V, D, H = 4, 10, 64, 300, 128

    glove = jax.random.normal(k_tab, (V, D), dtype=jnp.float32)       # frozen table
    indices = jax.random.randint(k_idx, (B, S), 0, V, dtype=jnp.int32)
    lengths = jax.random.randint(k_len, (B,), 1, S + 1, dtype=jnp.int32)

    scale = 1.0 / (H ** 0.5)
    w_ih = jax.random.uniform(k_wi, (4 * H, D), jnp.float32, -scale, scale)
    w_hh = jax.random.uniform(k_wh, (4 * H, H), jnp.float32, -scale, scale)
    b_ih = jax.random.uniform(k_bi, (4 * H,), jnp.float32, -scale, scale)
    b_hh = jax.random.uniform(k_bh, (4 * H,), jnp.float32, -scale, scale)

    out = uni_lstm_forward(indices, lengths, glove, w_ih, w_hh, b_ih, b_hh,
                           t_chunk=4)
    jax.block_until_ready(out)

    ref = uni_lstm_reference(indices, lengths, glove, w_ih, w_hh, b_ih, b_hh)
    assert out.shape == (B, H)
    max_err = float(jnp.max(jnp.abs(out - ref)))
    # bf16 weights / streamed pre-gates (f32 accumulation) => looser tolerance
    # than the pure-f32 version, as expected.
    assert jnp.allclose(out, ref, atol=5e-2, rtol=5e-2), f"max_err={max_err}"

    print("KERNEL_OK")
</pallas_src>

<mosaic_0001>
module attributes {stable_mosaic.version = 11 : i64} {
  func.func @_lstm_chunk_kernel(%arg0: i32, %arg1: memref<1xi32, #tpu.memory_space<smem>>, %arg2: memref<4x8x512xbf16, #tpu.memory_space<vmem>>, %arg3: memref<8x1xi32, #tpu.memory_space<vmem>>, %arg4: memref<128x512xbf16, #tpu.memory_space<vmem>>, %arg5: memref<8x128xf32, #tpu.memory_space<vmem>>, %arg6: memref<8x128xf32, #tpu.memory_space<vmem>>, %arg7: memref<8x128xf32, #tpu.memory_space<vmem>>) attributes {dimension_semantics = [#tpu.dimension_semantics<arbitrary>], iteration_bounds = array<i64: 3>, scalar_prefetch = 1 : i64, scratch_operands = 2 : i64, tpu.core_type = #tpu.core_type<tc>, window_params = [{transform_indices = @transform_0, window_bounds = array<i64: 4, 8, 512>}, {pipeline_mode = #tpu.pipeline_mode<synchronous>, transform_indices = @transform_1, window_bounds = array<i64: 8, 1>}, {pipeline_mode = #tpu.pipeline_mode<synchronous>, transform_indices = @transform_2, window_bounds = array<i64: 128, 512>}, {pipeline_mode = #tpu.pipeline_mode<synchronous>, transform_indices = @transform_3, window_bounds = array<i64: 8, 128>}]} {
    %c4_i32 = arith.constant 4 : i32
    %0 = arith.muli %arg0, %c4_i32 : i32
    %c0_i32 = arith.constant 0 : i32
    %1 = arith.cmpi eq, %arg0, %c0_i32 : i32
    %2 = arith.extui %1 : i1 to i32
    %c0_i32_0 = arith.constant 0 : i32
    %3 = arith.cmpi ne, %2, %c0_i32_0 : i32
    scf.if %3 {
      %cst = arith.constant 0.000000e+00 : f32
      %11 = vector.broadcast %cst : f32 to vector<8x128xf32>
      %c0_3 = arith.constant 0 : index
      %c0_4 = arith.constant 0 : index
      %12 = vector.load %arg6[%c0_3, %c0_4] : memref<8x128xf32, #tpu.memory_space<vmem>>, vector<8x128xf32>
      tpu.vector_store %arg6[%c0_3, %c0_4], %11 {strides = array<i32>} : memref<8x128xf32, #tpu.memory_space<vmem>>, vector<8x128xf32>,
      %cst_5 = arith.constant 0.000000e+00 : f32
      %13 = vector.broadcast %cst_5 : f32 to vector<8x128xf32>
      %c0_6 = arith.constant 0 : index
      %c0_7 = arith.constant 0 : index
      %14 = vector.load %arg7[%c0_6, %c0_7] : memref<8x128xf32, #tpu.memory_space<vmem>>, vector<8x128xf32>
      tpu.vector_store %arg7[%c0_6, %c0_7], %13 {strides = array<i32>} : memref<8x128xf32, #tpu.memory_space<vmem>>, vector<8x128xf32>,
    } else {
    }
    %c0 = arith.constant 0 : index
    %4 = memref.load %arg1[%c0] : memref<1xi32, #tpu.memory_space<smem>>
    %5 = arith.cmpi slt, %0, %4 : i32
    %6 = arith.extui %5 : i1 to i32
    %c0_i32_1 = arith.constant 0 : i32
    %7 = arith.cmpi ne, %6, %c0_i32_1 : i32
    scf.if %7 {
      %c0_3 = arith.constant 0 : index
      %c0_4 = arith.constant 0 : index
      %11 = vector.load %arg3[%c0_3, %c0_4] : memref<8x1xi32, #tpu.memory_space<vmem>>, vector<8x1xi32>
      %c0_5 = arith.constant 0 : index
      %c0_6 = arith.constant 0 : index
      %12 = vector.load %arg4[%c0_5, %c0_6] : memref<128x512xbf16, #tpu.memory_space<vmem>>, vector<128x512xbf16>
      %c0_7 = arith.constant 0 : index
      %c0_8 = arith.constant 0 : index
      %13 = vector.load %arg6[%c0_7, %c0_8] : memref<8x128xf32, #tpu.memory_space<vmem>>, vector<8x128xf32>
      %c0_9 = arith.constant 0 : index
      %c0_10 = arith.constant 0 : index
      %14 = vector.load %arg7[%c0_9, %c0_10] : memref<8x128xf32, #tpu.memory_space<vmem>>, vector<8x128xf32>
      %c0_i32_11 = arith.constant 0 : i32
      %15 = arith.index_cast %c0_i32_11 : i32 to index
      %c0_12 = arith.constant 0 : index
      %c0_13 = arith.constant 0 : index
      %16 = vector.load %arg2[%15, %c0_12, %c0_13] : memref<4x8x512xbf16, #tpu.memory_space<vmem>>, vector<1x8x512xbf16>
      %17 = vector.shape_cast %16 : vector<1x8x512xbf16> to vector<8x512xbf16>
      %18 = arith.extf %17 : vector<8x512xbf16> to vector<8x512xf32>
      %19 = arith.truncf %13 : vector<8x128xf32> to vector<8x128xbf16>
      %cst = arith.constant dense<0.000000e+00> : vector<8x512xf32>
      %20 = tpu.matmul %19, %12, %cst {dimension_numbers = #tpu.dot_dimension_numbers<[1], [0], [0], [1], [0, 0, 1, 1], [], []>} : vector<8x128xbf16>, vector<128x512xbf16>, vector<8x512xf32> -> vector<8x512xf32>
      %21 = arith.addf %18, %20 : vector<8x512xf32>
      %22 = vector.extract_strided_slice %21 {offsets = [0, 0], sizes = [8, 128], strides = [1, 1]} : vector<8x512xf32> to vector<8x128xf32>
      %23 = arith.negf %22 : vector<8x128xf32>
      %24 = math.exp %23 : vector<8x128xf32>
      %cst_14 = arith.constant 1.000000e+00 : f32
      %25 = vector.broadcast %cst_14 : f32 to vector<8x128xf32>
      %26 = arith.addf %25, %24 : vector<8x128xf32>
      %27 = arith.divf %25, %26 : vector<8x128xf32>
      %28 = vector.extract_strided_slice %21 {offsets = [0, 128], sizes = [8, 128], strides = [1, 1]} : vector<8x512xf32> to vector<8x128xf32>
      %29 = arith.negf %28 : vector<8x128xf32>
      %30 = math.exp %29 : vector<8x128xf32>
      %cst_15 = arith.constant 1.000000e+00 : f32
      %31 = vector.broadcast %cst_15 : f32 to vector<8x128xf32>
      %32 = arith.addf %31, %30 : vector<8x128xf32>
      %33 = arith.divf %31, %32 : vector<8x128xf32>
      %34 = vector.extract_strided_slice %21 {offsets = [0, 256], sizes = [8, 128], strides = [1, 1]} : vector<8x512xf32> to vector<8x128xf32>
      %35 = math.tanh %34 : vector<8x128xf32>
      %36 = vector.extract_strided_slice %21 {offsets = [0, 384], sizes = [8, 128], strides = [1, 1]} : vector<8x512xf32> to vector<8x128xf32>
      %37 = arith.negf %36 : vector<8x128xf32>
      %38 = math.exp %37 : vector<8x128xf32>
      %cst_16 = arith.constant 1.000000e+00 : f32
      %39 = vector.broadcast %cst_16 : f32 to vector<8x128xf32>
      %40 = arith.addf %39, %38 : vector<8x128xf32>
      %41 = arith.divf %39, %40 : vector<8x128xf32>
      %42 = arith.mulf %33, %14 : vector<8x128xf32>
      %43 = arith.mulf %27, %35 : vector<8x128xf32>
      %44 = arith.addf %42, %43 : vector<8x128xf32>
      %45 = math.tanh %44 : vector<8x128xf32>
      %46 = arith.mulf %41, %45 : vector<8x128xf32>
      %47 = arith.addi %0, %c0_i32_11 : i32
      %48 = vector.broadcast %47 : i32 to vector<8x1xi32>
      %49 = arith.cmpi slt, %48, %11 : vector<8x1xi32>
      %50 = vector.shape_cast %49 : vector<8x1xi1> to vector<8x1xi1>
      %51 = vector.broadcast %50 : vector<8x1xi1> to vector<8x128xi1>
      %52 = arith.select %51, %46, %13 : vector<8x128xi1>, vector<8x128xf32>
      %53 = vector.shape_cast %49 : vector<8x1xi1> to vector<8x1xi1>
      %54 = vector.broadcast %53 : vector<8x1xi1> to vector<8x128xi1>
      %55 = arith.select %54, %44, %14 : vector<8x128xi1>, vector<8x128xf32>
      %c1_i32 = arith.constant 1 : i32
      %56 = arith.index_cast %c1_i32 : i32 to index
      %c0_17 = arith.constant 0 : index
      %c0_18 = arith.constant 0 : index
      %57 = vector.load %arg2[%56, %c0_17, %c0_18] : memref<4x8x512xbf16, #tpu.memory_space<vmem>>, vector<1x8x512xbf16>
      %58 = vector.shape_cast %57 : vector<1x8x512xbf16> to vector<8x512xbf16>
      %59 = arith.extf %58 : vector<8x512xbf16> to vector<8x512xf32>
      %60 = arith.truncf %52 : vector<8x128xf32> to vector<8x128xbf16>
      %cst_19 = arith.constant dense<0.000000e+00> : vector<8x512xf32>
      %61 = tpu.matmul %60, %12, %cst_19 {dimension_numbers = #tpu.dot_dimension_numbers<[1], [0], [0], [1], [0, 0, 1, 1], [], []>} : vector<8x128xbf16>, vector<128x512xbf16>, vector<8x512xf32> -> vector<8x512xf32>
      %62 = arith.addf %59, %61 : vector<8x512xf32>
      %63 = vector.extract_strided_slice %62 {offsets = [0, 0], sizes = [8, 128], strides = [1, 1]} : vector<8x512xf32> to vector<8x128xf32>
      %64 = arith.negf %63 : vector<8x128xf32>
      %65 = math.exp %64 : vector<8x128xf32>
      %cst_20 = arith.constant 1.000000e+00 : f32
      %66 = vector.broadcast %cst_20 : f32 to vector<8x128xf32>
      %67 = arith.addf %66, %65 : vector<8x128xf32>
      %68 = arith.divf %66, %67 : vector<8x128xf32>
      %69 = vector.extract_strided_slice %62 {offsets = [0, 128], sizes = [8, 128], strides = [1, 1]} : vector<8x512xf32> to vector<8x128xf32>
      %70 = arith.negf %69 : vector<8x128xf32>
      %71 = math.exp %70 : vector<8x128xf32>
      %cst_21 = arith.constant 1.000000e+00 : f32
      %72 = vector.broadcast %cst_21 : f32 to vector<8x128xf32>
      %73 = arith.addf %72, %71 : vector<8x128xf32>
      %74 = arith.divf %72, %73 : vector<8x128xf32>
      %75 = vector.extract_strided_slice %62 {offsets = [0, 256], sizes = [8, 128], strides = [1, 1]} : vector<8x512xf32> to vector<8x128xf32>
      %76 = math.tanh %75 : vector<8x128xf32>
      %77 = vector.extract_strided_slice %62 {offsets = [0, 384], sizes = [8, 128], strides = [1, 1]} : vector<8x512xf32> to vector<8x128xf32>
      %78 = arith.negf %77 : vector<8x128xf32>
      %79 = math.exp %78 : vector<8x128xf32>
      %cst_22 = arith.constant 1.000000e+00 : f32
      %80 = vector.broadcast %cst_22 : f32 to vector<8x128xf32>
      %81 = arith.addf %80, %79 : vector<8x128xf32>
      %82 = arith.divf %80, %81 : vector<8x128xf32>
      %83 = arith.mulf %74, %55 : vector<8x128xf32>
      %84 = arith.mulf %68, %76 : vector<8x128xf32>
      %85 = arith.addf %83, %84 : vector<8x128xf32>
      %86 = math.tanh %85 : vector<8x128xf32>
      %87 = arith.mulf %82, %86 : vector<8x128xf32>
      %88 = arith.addi %0, %c1_i32 : i32
      %89 = vector.broadcast %88 : i32 to vector<8x1xi32>
      %90 = arith.cmpi slt, %89, %11 : vector<8x1xi32>
      %91 = vector.shape_cast %90 : vector<8x1xi1> to vector<8x1xi1>
      %92 = vector.broadcast %91 : vector<8x1xi1> to vector<8x128xi1>
      %93 = arith.select %92, %87, %52 : vector<8x128xi1>, vector<8x128xf32>
      %94 = vector.shape_cast %90 : vector<8x1xi1> to vector<8x1xi1>
      %95 = vector.broadcast %94 : vector<8x1xi1> to vector<8x128xi1>
      %96 = arith.select %95, %85, %55 : vector<8x128xi1>, vector<8x128xf32>
      %c2_i32_23 = arith.constant 2 : i32
      %97 = arith.index_cast %c2_i32_23 : i32 to index
      %c0_24 = arith.constant 0 : index
      %c0_25 = arith.constant 0 : index
      %98 = vector.load %arg2[%97, %c0_24, %c0_25] : memref<4x8x512xbf16, #tpu.memory_space<vmem>>, vector<1x8x512xbf16>
      %99 = vector.shape_cast %98 : vector<1x8x512xbf16> to vector<8x512xbf16>
      %100 = arith.extf %99 : vector<8x512xbf16> to vector<8x512xf32>
      %101 = arith.truncf %93 : vector<8x128xf32> to vector<8x128xbf16>
      %cst_26 = arith.constant dense<0.000000e+00> : vector<8x512xf32>
      %102 = tpu.matmul %101, %12, %cst_26 {dimension_numbers = #tpu.dot_dimension_numbers<[1], [0], [0], [1], [0, 0, 1, 1], [], []>} : vector<8x128xbf16>, vector<128x512xbf16>, vector<8x512xf32> -> vector<8x512xf32>
      %103 = arith.addf %100, %102 : vector<8x512xf32>
      %104 = vector.extract_strided_slice %103 {offsets = [0, 0], sizes = [8, 128], strides = [1, 1]} : vector<8x512xf32> to vector<8x128xf32>
      %105 = arith.negf %104 : vector<8x128xf32>
      %106 = math.exp %105 : vector<8x128xf32>
      %cst_27 = arith.constant 1.000000e+00 : f32
      %107 = vector.broadcast %cst_27 : f32 to vector<8x128xf32>
      %108 = arith.addf %107, %106 : vector<8x128xf32>
      %109 = arith.divf %107, %108 : vector<8x128xf32>
      %110 = vector.extract_strided_slice %103 {offsets = [0, 128], sizes = [8, 128], strides = [1, 1]} : vector<8x512xf32> to vector<8x128xf32>
      %111 = arith.negf %110 : vector<8x128xf32>
      %112 = math.exp %111 : vector<8x128xf32>
      %cst_28 = arith.constant 1.000000e+00 : f32
      %113 = vector.broadcast %cst_28 : f32 to vector<8x128xf32>
      %114 = arith.addf %113, %112 : vector<8x128xf32>
      %115 = arith.divf %113, %114 : vector<8x128xf32>
      %116 = vector.extract_strided_slice %103 {offsets = [0, 256], sizes = [8, 128], strides = [1, 1]} : vector<8x512xf32> to vector<8x128xf32>
      %117 = math.tanh %116 : vector<8x128xf32>
      %118 = vector.extract_strided_slice %103 {offsets = [0, 384], sizes = [8, 128], strides = [1, 1]} : vector<8x512xf32> to vector<8x128xf32>
      %119 = arith.negf %118 : vector<8x128xf32>
      %120 = math.exp %119 : vector<8x128xf32>
      %cst_29 = arith.constant 1.000000e+00 : f32
      %121 = vector.broadcast %cst_29 : f32 to vector<8x128xf32>
      %122 = arith.addf %121, %120 : vector<8x128xf32>
      %123 = arith.divf %121, %122 : vector<8x128xf32>
      %124 = arith.mulf %115, %96 : vector<8x128xf32>
      %125 = arith.mulf %109, %117 : vector<8x128xf32>
      %126 = arith.addf %124, %125 : vector<8x128xf32>
      %127 = math.tanh %126 : vector<8x128xf32>
      %128 = arith.mulf %123, %127 : vector<8x128xf32>
      %129 = arith.addi %0, %c2_i32_23 : i32
      %130 = vector.broadcast %129 : i32 to vector<8x1xi32>
      %131 = arith.cmpi slt, %130, %11 : vector<8x1xi32>
      %132 = vector.shape_cast %131 : vector<8x1xi1> to vector<8x1xi1>
      %133 = vector.broadcast %132 : vector<8x1xi1> to vector<8x128xi1>
      %134 = arith.select %133, %128, %93 : vector<8x128xi1>, vector<8x128xf32>
      %135 = vector.shape_cast %131 : vector<8x1xi1> to vector<8x1xi1>
      %136 = vector.broadcast %135 : vector<8x1xi1> to vector<8x128xi1>
      %137 = arith.select %136, %126, %96 : vector<8x128xi1>, vector<8x128xf32>
      %c3_i32 = arith.constant 3 : i32
      %138 = arith.index_cast %c3_i32 : i32 to index
      %c0_30 = arith.constant 0 : index
      %c0_31 = arith.constant 0 : index
      %139 = vector.load %arg2[%138, %c0_30, %c0_31] : memref<4x8x512xbf16, #tpu.memory_space<vmem>>, vector<1x8x512xbf16>
      %140 = vector.shape_cast %139 : vector<1x8x512xbf16> to vector<8x512xbf16>
      %141 = arith.extf %140 : vector<8x512xbf16> to vector<8x512xf32>
      %142 = arith.truncf %134 : vector<8x128xf32> to vector<8x128xbf16>
      %cst_32 = arith.constant dense<0.000000e+00> : vector<8x512xf32>
      %143 = tpu.matmul %142, %12, %cst_32 {dimension_numbers = #tpu.dot_dimension_numbers<[1], [0], [0], [1], [0, 0, 1, 1], [], []>} : vector<8x128xbf16>, vector<128x512xbf16>, vector<8x512xf32> -> vector<8x512xf32>
      %144 = arith.addf %141, %143 : vector<8x512xf32>
      %145 = vector.extract_strided_slice %144 {offsets = [0, 0], sizes = [8, 128], strides = [1, 1]} : vector<8x512xf32> to vector<8x128xf32>
      %146 = arith.negf %145 : vector<8x128xf32>
      %147 = math.exp %146 : vector<8x128xf32>
      %cst_33 = arith.constant 1.000000e+00 : f32
      %148 = vector.broadcast %cst_33 : f32 to vector<8x128xf32>
      %149 = arith.addf %148, %147 : vector<8x128xf32>
      %150 = arith.divf %148, %149 : vector<8x128xf32>
      %151 = vector.extract_strided_slice %144 {offsets = [0, 128], sizes = [8, 128], strides = [1, 1]} : vector<8x512xf32> to vector<8x128xf32>
      %152 = arith.negf %151 : vector<8x128xf32>
      %153 = math.exp %152 : vector<8x128xf32>
      %cst_34 = arith.constant 1.000000e+00 : f32
      %154 = vector.broadcast %cst_34 : f32 to vector<8x128xf32>
      %155 = arith.addf %154, %153 : vector<8x128xf32>
      %156 = arith.divf %154, %155 : vector<8x128xf32>
      %157 = vector.extract_strided_slice %144 {offsets = [0, 256], sizes = [8, 128], strides = [1, 1]} : vector<8x512xf32> to vector<8x128xf32>
      %158 = math.tanh %157 : vector<8x128xf32>
      %159 = vector.extract_strided_slice %144 {offsets = [0, 384], sizes = [8, 128], strides = [1, 1]} : vector<8x512xf32> to vector<8x128xf32>
      %160 = arith.negf %159 : vector<8x128xf32>
      %161 = math.exp %160 : vector<8x128xf32>
      %cst_35 = arith.constant 1.000000e+00 : f32
      %162 = vector.broadcast %cst_35 : f32 to vector<8x128xf32>
      %163 = arith.addf %162, %161 : vector<8x128xf32>
      %164 = arith.divf %162, %163 : vector<8x128xf32>
      %165 = arith.mulf %156, %137 : vector<8x128xf32>
      %166 = arith.mulf %150, %158 : vector<8x128xf32>
      %167 = arith.addf %165, %166 : vector<8x128xf32>
      %168 = math.tanh %167 : vector<8x128xf32>
      %169 = arith.mulf %164, %168 : vector<8x128xf32>
      %170 = arith.addi %0, %c3_i32 : i32
      %171 = vector.broadcast %170 : i32 to vector<8x1xi32>
      %172 = arith.cmpi slt, %171, %11 : vector<8x1xi32>
      %173 = vector.shape_cast %172 : vector<8x1xi1> to vector<8x1xi1>
      %174 = vector.broadcast %173 : vector<8x1xi1> to vector<8x128xi1>
      %175 = arith.select %174, %169, %134 : vector<8x128xi1>, vector<8x128xf32>
      %176 = vector.shape_cast %172 : vector<8x1xi1> to vector<8x1xi1>
      %177 = vector.broadcast %176 : vector<8x1xi1> to vector<8x128xi1>
      %178 = arith.select %177, %167, %137 : vector<8x128xi1>, vector<8x128xf32>
      %c4_i32_36 = arith.constant 4 : i32
      %c0_37 = arith.constant 0 : index
      %c0_38 = arith.constant 0 : index
      %179 = vector.load %arg6[%c0_37, %c0_38] : memref<8x128xf32, #tpu.memory_space<vmem>>, vector<8x128xf32>
      tpu.vector_store %arg6[%c0_37, %c0_38], %175 {strides = array<i32>} : memref<8x128xf32, #tpu.memory_space<vmem>>, vector<8x128xf32>,
      %c0_39 = arith.constant 0 : index
      %c0_40 = arith.constant 0 : index
      %180 = vector.load %arg7[%c0_39, %c0_40] : memref<8x128xf32, #tpu.memory_space<vmem>>, vector<8x128xf32>
      tpu.vector_store %arg7[%c0_39, %c0_40], %178 {strides = array<i32>} : memref<8x128xf32, #tpu.memory_space<vmem>>, vector<8x128xf32>,
    } else {
    }
    %c2_i32 = arith.constant 2 : i32
    %8 = arith.cmpi eq, %arg0, %c2_i32 : i32
    %9 = arith.extui %8 : i1 to i32
    %c0_i32_2 = arith.constant 0 : i32
    %10 = arith.cmpi ne, %9, %c0_i32_2 : i32
    scf.if %10 {
      %c0_3 = arith.constant 0 : index
      %c0_4 = arith.constant 0 : index
      %11 = vector.load %arg6[%c0_3, %c0_4] : memref<8x128xf32, #tpu.memory_space<vmem>>, vector<8x128xf32>
      %c0_5 = arith.constant 0 : index
      %c0_6 = arith.constant 0 : index
      %12 = vector.load %arg5[%c0_5, %c0_6] : memref<8x128xf32, #tpu.memory_space<vmem>>, vector<8x128xf32>
      tpu.vector_store %arg5[%c0_5, %c0_6], %11 {strides = array<i32>} : memref<8x128xf32, #tpu.memory_space<vmem>>, vector<8x128xf32>,
    } else {
    }
    return
  }
  func.func @transform_0(%arg0: i32, %arg1: memref<1xi32, #tpu.memory_space<smem>>) -> (i32, i32, i32) {
    %c0_i32 = arith.constant 0 : i32
    %c0_i32_0 = arith.constant 0 : i32
    %c0_i32_1 = arith.constant 0 : i32
    return %arg0, %c0_i32, %c0_i32_0 : i32, i32, i32
  }
  func.func @transform_1(%arg0: i32, %arg1: memref<1xi32, #tpu.memory_space<smem>>) -> (i32, i32) {
    %c0_i32 = arith.constant 0 : i32
    %c0_i32_0 = arith.constant 0 : i32
    %c0_i32_1 = arith.constant 0 : i32
    return %c0_i32, %c0_i32_0 : i32, i32
  }
  func.func @transform_2(%arg0: i32, %arg1: memref<1xi32, #tpu.memory_space<smem>>) -> (i32, i32) {
    %c0_i32 = arith.constant 0 : i32
    %c0_i32_0 = arith.constant 0 : i32
    %c0_i32_1 = arith.constant 0 : i32
    return %c0_i32, %c0_i32_0 : i32, i32
  }
  func.func @transform_3(%arg0: i32, %arg1: memref<1xi32, #tpu.memory_space<smem>>) -> (i32, i32) {
    %c0_i32 = arith.constant 0 : i32
    %c0_i32_0 = arith.constant 0 : i32
    %c0_i32_1 = arith.constant 0 : i32
    return %c0_i32, %c0_i32_0 : i32, i32
  }
}

</mosaic_0001>

<bundles_post_ra>
// kernel: tpu_custom_call.1
= control target key start
LH: loop header
LB: loop body
LE: loop exit
PB: predicated region body
PF: predicated region fallthrough
CT: control target
= control target key end

     0   :  { %s1824_s0 = inlined_call_operand.<no memory space> [shape: s32[1], index: 0, kind: input, shape index: {}]   ;;  %s1825_s1 = inlined_call_operand.hbm [shape: bf16[12,8,512], index: 1, kind: input, shape index: {}]   ;;  %s1826_s2 = inlined_call_operand.vmem [shape: s32[8,1], index: 2, kind: input, shape index: {}]   ;;  %s1827_s3 = inlined_call_operand.hbm [shape: bf16[128,512], index: 3, kind: input, shape index: {}]   ;;  %s1828_s4 = inlined_call_operand.hbm [shape: f32[8,128], index: 4, kind: output, shape index: {}]  }
   0x1   :  { %9 = sst [smem:[#allocation5]] %s1824_s0 }
   0x2   :  { %10 = vsyncpa [#allocation7], 0 }
   0x3   :  { %12 = vsyncpa [#allocation7 + $0x1], 0 }
   0x4   :  { %13 = vsyncpa [#allocation10], 0 }
   0x5   :  { %14 = vsyncpa [#allocation8], 0  ;;  %s1398_s17 = smov 0   ;;  %s1400_s18 = smov 0  }
   0x6   :  { %s1402_s19 = smov 0   ;;  %s1404_s20 = smov 0  }
   0x7 LB: > { %s1417_s0 = sadd.s32 4294967295, %s1361_s20   ;;  %p40_p0 = scmp.ne.s32.totalorder %s1353_s18, %s1349_s17  ;;  %s1361_s20 = sphi %s1404_s20, %s1844_s20   ;;  %s1357_s19 = sphi %s1402_s19, %s1843_s19   ;;  %s1353_s18 = sphi %s1400_s18, %s1842_s18   ;;  %s1349_s17 = sphi %s1398_s17, %s1841_s17  }
   0x8   : > { %p1829_p1 = scmp.eq.s32.totalorder %s1417_s0, 0  ;;  %p990_p2 = scmp.ge.s32.totalorder %s1361_s20, 1 }
   0x9   : > { %p114_p3 = scmp.lt.s32.totalorder %s1361_s20, 4  ;;  %s1363_s23 = smov [#allocation9]  }
   0xa   : > { %p1426_p5 = por %p1829_p1, %p40_p0  ;;  %s129_s24 = sshll.u32 %s1363_s23, 4  ;;  %s130_s24 = int_to_ptr.vmem [resolvable:$true] %s129_s24 }
   0xb   : > { %p1430_p6 = pnand %p990_p2, %p114_p3  ;;  %s1443_s26 = sadd.s32 1, %s1361_s20  }
   0xc   : > { %s1832_s21 = scalar_select %p1426_p5, 1, 0 }
   0xd   : > { %s1833_s22 = scalar_select %p1430_p6, 1, 0 }
   0xe   : > { %p1070_p7 = pneg %p1430_p6  ;;  %s27_s27 = sadd.s32 1, %s1357_s19 }
   0xf   : > { %s24_s28 = ssub.s32 %s1361_s20, %s1443_s26  ;;  %s1235_s5 = scalar_lea.hbm %s1827_s3, 4096 }
  0x10   : > { %p1438_p8 = pnand %p1070_p7, %p1829_p1  ;;  %p1236_p9 = scmp.ne.s32.totalorder %s1827_s3, %s1235_s5 }
  0x11   : > { %p1242_p13 = scmp.lt.u32.totalorder %s1235_s5, %s1827_s3 }
  0x12   : > { %p1237_p10 = pneg %p1438_p8 }
  0x14   : > { %p1238_p11 = pnand %p1237_p10, %p1236_p9 }
  0x16   : > { %p1239_p12 = pneg %p1238_p11 }
  0x18   : > { %p1244_p0 = pnand %p1242_p13, %p1239_p12 }
  0x1a   : > { %1247 = shalt.err (!%p1244_p0)
}
  0x1b   : > { %s1248_s10 = scalar_lea.vmem %s130_s24, 4096  ;;  %p1256_p4 = scmp.lt.s32.totalorder %s130_s24, %s130_s24 }
  0x1c   : > { %p1249_p2 = scmp.ne.s32.totalorder %s130_s24, %s1248_s10  ;;  %p1257_p1 = scmp.lt.s32.totalorder %s1248_s10, %s1248_s10 }
  0x1e   : > { %p1251_p3 = pnand %p1249_p2, %p1237_p10  ;;  %p1258_p5 = por %p1257_p1, %p1256_p4 }
  0x20   : > { %p1252_p7 = pneg %p1251_p3 }
  0x22   : > { %p1259_p6 = pnand %p1258_p5, %p1252_p7 }
  0x24   : > { %1262 = shalt.err (!%p1259_p6)
}
  0x25   : > { %s1364_s11 = smov 256   ;;  %s1365_s12 = smov 16  }
  0x26   : > { %1073 = dma.hbm_to_vmem [thread:$0]  (!%p1438_p8), %s1827_s3, 4096, %s130_s24, [#allocation10], %s1364_s11, %s1364_s11, %s1365_s12  }
  0x27   : > { %p25_p1 = scmp.eq.s32.totalorder %s24_s28, 0  ;;  %p34_p4 = scmp.ne.s32.totalorder %s1357_s19, %s1353_s18 }
  0x28   : > { %p35_p5 = scmp.eq.s32.totalorder %s1361_s20, 0  ;;  %p1079_p6 = scmp.lt.s32.totalorder %s1361_s20, 3 }
  0x29   : > { %s1472_s15 = scalar_select %p25_p1, %s1357_s19, %s27_s27  }
  0x2a   : > { %p36_p9 = por %p35_p5, %p34_p4  ;;  %s143_s16 = sand.u32 1, %s1357_s19  }
  0x2b   : > { %s993_s17 = sshll.u32 %s143_s16, 6  ;;  %s1059_s23 = sshll.u32 %s1361_s20, 10 }
  0x2c   : > { %s1479_s25 = scalar_lea.hbm %s1825_s1, %s1059_s23  ;;  %s147_s24 = scalar_lea.vmem [#allocation6], %s993_s17 }
  0x2d   : > { %s155_s28 = sshll.u32 %s147_s24, 4  ;;  %p1483_p8 = pnand %p1079_p6, %p36_p9  ;;  %s1481_s28 = int_to_ptr.vmem [resolvable:$true] %s155_s28 }
  0x2e   : > { %s1487_s20 = scalar_lea.sflag [#allocation7], %s143_s16  ;;  %s1263_s5 = scalar_lea.hbm %s1479_s25, 1024 }
  0x2f   : > { %p1264_p10 = scmp.ne.s32.totalorder %s1479_s25, %s1263_s5  ;;  %p1265_p11 = pneg %p1483_p8 }
  0x30   : > { %s1268_s8 = scalar_lea.hbm %s1825_s1, 3072  ;;  %p1269_p0 = scmp.lt.u32.totalorder %s1479_s25, %s1825_s1 }
  0x31   : > { %p1266_p12 = pnand %p1265_p11, %p1264_p10  ;;  %p1270_p2 = scmp.lt.u32.totalorder %s1268_s8, %s1263_s5 }
  0x32   : > { %p1272_p7 = scmp.lt.u32.totalorder %s1263_s5, %s1479_s25 }
  0x33   : > { %p1267_p13 = pneg %p1266_p12  ;;  %p1271_p3 = por %p1270_p2, %p1269_p0 }
  0x35   : > { %p1273_p1 = por %p1272_p7, %p1271_p3 }
  0x37   : > { %p1274_p4 = pnand %p1273_p1, %p1267_p13 }
  0x39   : > { %1277 = shalt.err (!%p1274_p4)
}
  0x3a   : > { %s1278_s13 = scalar_lea.vmem %s1481_s28, 1024  ;;  %s1366_s14 = smov [#allocation6]  }
  0x3b   : > { %p1279_p5 = scmp.ne.s32.totalorder %s1481_s28, %s1278_s13  ;;  %s1283_s16 = sshll.u32 %s1366_s14, 4  ;;  %s1284_s16 = int_to_ptr.vmem [resolvable:$false] %s1283_s16 }
  0x3c   : > { %s1285_s17 = scalar_lea.vmem %s1284_s16, 2048  ;;  %p1286_p10 = scmp.lt.s32.totalorder %s1481_s28, %s1284_s16 }
  0x3d   : > { %p1281_p6 = pnand %p1279_p5, %p1265_p11  ;;  %p1287_p12 = scmp.lt.s32.totalorder %s1285_s17, %s1278_s13 }
  0x3f   : > { %p1282_p9 = pneg %p1281_p6  ;;  %p1288_p0 = por %p1287_p12, %p1286_p10 }
  0x41   : > { %p1289_p2 = pnand %p1288_p0, %p1282_p9 }
  0x43   : > { %1292 = shalt.err (!%p1289_p2)
}
  0x44   : > { %1077 = dma.hbm_to_vmem [thread:$0]  (!%p1483_p8), %s1479_s25, 1024, %s1481_s28, %s1487_s20, %s1364_s11, %s1364_s11, %s1365_s12  }
  0x45   : > { %p1836_p11 = scmp.ne.s32.totalorder %s1833_s22, 0 }
  0x46   : > { %s169_s23 = sand.u32 (!%p1836_p11), 1, %s1353_s18   ;;  %p1837_p13 = scmp.ne.s32.totalorder (!%p1836_p11), %s1832_s21, 0 }
  0x47   : > { %167 = sbr.rel (%p1836_p11) target bundleno = 1209 (0x4b9), region = 32  ;;  %s998_s29 = sshll.u32 (!%p1836_p11), %s169_s23, 6 }
  0x48   : > { %s170_s30 = scalar_lea.sflag (!%p1836_p11), [#allocation7], %s169_s23  ;;  %s1521_s24 = scalar_lea.vmem (!%p1836_p11), [#allocation6], %s998_s29 }
  0x4e   : > { %1336 = dma.done.wait (%p1837_p13), %s170_s30, 1024  }
  0x4f   : > { %1338 = vsyncadd (%p1837_p13), %s170_s30, 4294966272  ;;  %p1838_p3 = scmp.eq.s32.totalorder %s1417_s0, 0 }
  0x51   : > { %1340 = dma.done.wait (%p1838_p3), [#allocation10], 4096   ;;  %p1839_p8 = pmov %p1838_p3 }
  0x52   : > { %s1532_s22 = sshll.u32 %s1417_s0, 2  ;;  %p1840_p7 = scmp.ne.s32.totalorder %s1417_s0, 0 }
  0x53   : > { %1342 = vsyncadd (%p1839_p8), [#allocation10], 4294963200  ;;  %v1367_v0 = vmov (!%p1840_p7), 0.0  }
  0x54   : > { %201 = sbr.rel (%p1840_p7) target bundleno = 91 (0x5b), region = 44  ;;  %202 = vst [vmem:[#allocation2] sm:$0xff] (!%p1840_p7), %v1367_v0  ;;  %203 = vst [vmem:[#allocation3] sm:$0xff] (!%p1840_p7), %v1367_v0 }
  0x5b PF: > { %s204_s11 = sld [smem:[#allocation5]] }
  0x61   : > { %p1002_p1 = scmp.ge.s32.totalorder %s1532_s22, %s204_s11 }
  0x62   : > { %v1537_v1 = vld [vmem:[#allocation9 + $0x4] ss:$16 sps:$4 sm:$0xff] (!%p1002_p1)   ;;  %v1539_v2 = vld [vmem:[#allocation9] ss:$16 sps:$4 sm:$0xff] (!%p1002_p1)   ;;  %v1368_v3 = vmov (!%p1002_p1), 0   ;;  %s648_s21 = sadd.s32 (!%p1002_p1), 1, %s1532_s22  ;;  %v521_v24 = vstv (!%p1002_p1), %s1532_s22 }
  0x63   : > { %208 = sbr.rel (%p1002_p1) target bundleno = 1175 (0x497), region = 48  ;;  %443 = vmatprep.mubr.bf16.mxu0 (!%p1002_p1), %v1368_v3  ;;  %484 = vmatprep.mubr.bf16.mxu1 (!%p1002_p1), %v1368_v3  ;;  %v1544_v4 = vld [vmem:[#allocation9 + $0x24] ss:$16 sps:$4 sm:$0xff] (!%p1002_p1)   ;;  %v1548_v5 = vld [vmem:[#allocation9 + $0x20] ss:$16 sps:$4 sm:$0xff] (!%p1002_p1)   ;;  %v649_v26 = vstv (!%p1002_p1), %s648_s21  ;;  %v245_v45 = vld [vmem:[%s1521_s24 + $0x8] sm:$0xff] (!%p1002_p1) }
  0x64   : > { %411 = vmatprep.subr.bf16.mxu0 (!%p1002_p1), %v1537_v1  ;;  %1121 = vset.pattern.permute.xlu0 (!%p1002_p1), %v1368_v3  ;;  %v1552_v6 = vld [vmem:[#allocation9 + $0x44] ss:$16 sps:$4 sm:$0xff] (!%p1002_p1)   ;;  %v1554_v7 = vld [vmem:[#allocation9 + $0xc] ss:$16 sps:$4 sm:$0xff] (!%p1002_p1)   ;;  %v1556_v8 = vld [vmem:[#allocation9 + $0x8] ss:$16 sps:$4 sm:$0xff] (!%p1002_p1)   ;;  %v249_v52 = vunpack.c.h.bf16 (!%p1002_p1), %v245_v45  ;;  %v248_v58 = vunpack.c.l.bf16 (!%p1002_p1), %v245_v45 }
  0x65   : > { %412 = vmatpush1.bf16.msra.mxu0 (!%p1002_p1), %v1539_v2  ;;  %1122 = vset.pattern.permute.xlu1 (!%p1002_p1), %v1368_v3  ;;  %v1559_v9 = vld [vmem:[#allocation9 + $0x40] ss:$16 sps:$4 sm:$0xff] (!%p1002_p1)   ;;  %v1563_v10 = vld [vmem:[#allocation9 + $0x64] ss:$16 sps:$4 sm:$0xff] (!%p1002_p1)   ;;  %v1566_v11 = vld [vmem:[#allocation9 + $0x2c] ss:$16 sps:$4 sm:$0xff] (!%p1002_p1)  }
  0x66   : > { %413 = vmatprep.subr.bf16.mxu0 (!%p1002_p1), %v1544_v4  ;;  %452 = vmatprep.subr.bf16.mxu1 (!%p1002_p1), %v1554_v7  ;;  %v1568_v12 = vld [vmem:[#allocation9 + $0x28] ss:$16 sps:$4 sm:$0xff] (!%p1002_p1)   ;;  %v1572_v13 = vld [vmem:[#allocation9 + $0x60] ss:$16 sps:$4 sm:$0xff] (!%p1002_p1)   ;;  %v1574_v14 = vld [vmem:[#allocation9 + $0x84] ss:$16 sps:$4 sm:$0xff] (!%p1002_p1)  }
  0x67   : > { %453 = vmatpush1.bf16.msra.mxu1 (!%p1002_p1), %v1556_v8  ;;  %v1576_v15 = vld [vmem:[#allocation9 + $0x4c] ss:$16 sps:$4 sm:$0xff] (!%p1002_p1)   ;;  %v1580_v16 = vld [vmem:[#allocation9 + $0x48] ss:$16 sps:$4 sm:$0xff] (!%p1002_p1)   ;;  %v1586_v18 = vld [vmem:[#allocation9 + $0x80] ss:$16 sps:$4 sm:$0xff] (!%p1002_p1)  }
  0x68   : > { %454 = vmatprep.subr.bf16.mxu1 (!%p1002_p1), %v1566_v11  ;;  %v1583_v17 = vld [vmem:[#allocation9 + $0x6c] ss:$16 sps:$4 sm:$0xff] (!%p1002_p1)   ;;  %v1589_v19 = vld [vmem:[#allocation9 + $0xa4] ss:$16 sps:$4 sm:$0xff] (!%p1002_p1)   ;;  %v1592_v20 = vld [vmem:[#allocation9 + $0x68] ss:$16 sps:$4 sm:$0xff] (!%p1002_p1)  }
  0x69   : > { %414 = vmatpush1.bf16.msra.mxu0 (!%p1002_p1), %v1548_v5  ;;  %v1595_v21 = vld [vmem:[#allocation9 + $0x8c] ss:$16 sps:$4 sm:$0xff] (!%p1002_p1)   ;;  %v1598_v22 = vld [vmem:[#allocation9 + $0xa0] ss:$16 sps:$4 sm:$0xff] (!%p1002_p1)   ;;  %v1601_v23 = vld [vmem:[#allocation9 + $0xc4] ss:$16 sps:$4 sm:$0xff] (!%p1002_p1)  }
  0x6a   : > { %415 = vmatprep.subr.bf16.mxu0 %v1552_v6  ;;  %v1606_v25 = vld [vmem:[#allocation9 + $0x88] ss:$16 sps:$4 sm:$0xff]   ;;  %v1609_v27 = vld [vmem:[#allocation9 + $0xac] ss:$16 sps:$4 sm:$0xff]   ;;  %v1614_v28 = vld [vmem:[%s1826_s2] sm:$0xff]  ;;  %s776_s28 = sadd.s32 2, %s1532_s22 }
  0x6b   : > { %455 = vmatpush1.bf16.msra.mxu1 %v1568_v12  ;;  %vm522_vm0 = vcmp.lt.s32.totalorder %v521_v24, %v1614_v28  ;;  %v1618_v29 = vld [vmem:[#allocation9 + $0xc0] ss:$16 sps:$4 sm:$0xff]   ;;  %vm650_vm1 = vcmp.lt.s32.totalorder %v649_v26, %v1614_v28  ;;  %v1623_v31 = vld [vmem:[#allocation9 + $0xe4] ss:$16 sps:$4 sm:$0xff]   ;;  %v1626_v32 = vld [vmem:[#allocation9 + $0xa8] ss:$16 sps:$4 sm:$0xff]  }
  0x6c   : > { %456 = vmatprep.subr.bf16.mxu1 %v1576_v15  ;;  %v523_v30 = vsel %vm522_vm0, 1, %v1368_v3  ;;  %v1629_v33 = vld [vmem:[#allocation9 + $0xcc] ss:$16 sps:$4 sm:$0xff]   ;;  %v651_v34 = vsel %vm650_vm1, 1, %v1368_v3  ;;  %v1633_v35 = vld [vmem:[#allocation9 + $0xe0] ss:$16 sps:$4 sm:$0xff]  }
  0x6d   : > { %416 = vmatpush1.bf16.msra.mxu0 %v1559_v9  ;;  %525 = vperm.xlu0 %1121, %v523_v30   ;;  %v1635_v36 = vld [vmem:[#allocation2] sm:$0xff]  ;;  %v1639_v37 = vld [vmem:[#allocation9 + $0xc8] ss:$16 sps:$4 sm:$0xff]   ;;  %v1642_v38 = vld [vmem:[#allocation9 + $0xec] ss:$16 sps:$4 sm:$0xff]   ;;  %s904_s27 = sadd.s32 3, %s1532_s22 }
  0x6e   : > { %417 = vmatprep.subr.bf16.mxu0 %v1563_v10  ;;  %v250_v39 = vpack.c.bf16 %v1635_v36, %v1635_v36  ;;  %v1648_v40 = vld [vmem:[#allocation9 + $0xe8] ss:$16 sps:$4 sm:$0xff]   ;;  %v244_v41 = vld [vmem:[%s1521_s24] sm:$0xff] }
  0x6f   : > { %457 = vmatpush1.bf16.msra.mxu1 %v1580_v16  ;;  %v246_v42 = vunpack.c.l.bf16 %v244_v41  ;;  %v247_v43 = vunpack.c.h.bf16 %v244_v41 }
  0x70   : > { %458 = vmatprep.subr.bf16.mxu1 %v1583_v17 }
  0x71   : > { %418 = vmatpush1.bf16.msra.mxu0 %v1572_v13  ;;  %653 = vperm.xlu0 %1121, %v651_v34   ;;  %v243_v34 = vld [vmem:[#allocation3] sm:$0xff] }
  0x72   : > { %419 = vmatprep.subr.bf16.mxu0 %v1574_v14 }
  0x73   : > { %459 = vmatpush1.bf16.msra.mxu1 %v1592_v20 }
  0x74   : > { %460 = vmatprep.subr.bf16.mxu1 %v1595_v21 }
  0x75   : > { %420 = vmatpush1.bf16.msra.mxu0 %v1586_v18 }
  0x76   : > { %421 = vmatprep.subr.bf16.mxu0 %v1589_v19 }
  0x77   : > { %461 = vmatpush1.bf16.msra.mxu1 %v1606_v25 }
  0x78   : > { %462 = vmatprep.subr.bf16.mxu1 %v1609_v27 }
  0x79   : > { %422 = vmatpush1.bf16.msra.mxu0 %v1598_v22 }
  0x7a   : > { %423 = vmatprep.subr.bf16.mxu0 %v1601_v23 }
  0x7b   : > { %463 = vmatpush1.bf16.msra.mxu1 %v1626_v32 }
  0x7c   : > { %464 = vmatprep.subr.bf16.mxu1 %v1629_v33 }
  0x7d   : > { %424 = vmatpush1.bf16.msra.mxu0 %v1618_v29 }
  0x7e   : > { %425 = vmatprep.subr.bf16.mxu0 %v1623_v31 }
  0x7f   : > { %465 = vmatpush1.bf16.msra.mxu1 %v1639_v37 }
  0x80   : > { %466 = vmatprep.subr.bf16.mxu1 %v1642_v38 }
  0x81   : > { %426 = vmatpush1.bf16.msra.mxu0 %v1633_v35 }
  0x82   : > { %538 = vmatprep.subr.bf16.mxu0 %v1537_v1 }
  0x83   : > { %467 = vmatpush1.bf16.msra.mxu1 %v1648_v40 }
  0x84   : > { %444 = vmatmul.mubr.bf16.vlgmr.msra.gmra.mrb[0].mxu0 %v250_v39  ;;  %579 = vmatprep.subr.bf16.mxu1 %v1554_v7 }
  0x85   : > { %539 = vmatpush1.bf16.msra.mxu0 %v1539_v2  ;;  %570 = vmatprep.mubr.bf16.mxu0 %v1368_v3 }
  0x86   : > { %540 = vmatprep.subr.bf16.mxu0 %v1544_v4  ;;  %485 = vmatmul.mubr.bf16.vlgmr.msra.gmra.mrb[0].mxu1 %v250_v39 }
  0x87   : > { %580 = vmatpush1.bf16.msra.mxu1 %v1556_v8  ;;  %611 = vmatprep.mubr.bf16.mxu1 %v1368_v3 }
  0x88   : > { %581 = vmatprep.subr.bf16.mxu1 %v1566_v11 }
  0x89   : > { %541 = vmatpush1.bf16.msra.mxu0 %v1548_v5 }
  0x8a   : > { %542 = vmatprep.subr.bf16.mxu0 %v1552_v6 }
  0x8b   : > { %582 = vmatpush1.bf16.msra.mxu1 %v1568_v12 }
  0x8c   : > { %583 = vmatprep.subr.bf16.mxu1 %v1576_v15 }
  0x8d   : > { %543 = vmatpush1.bf16.msra.mxu0 %v1559_v9 }
  0x8e   : > { %544 = vmatprep.subr.bf16.mxu0 %v1563_v10 }
  0x8f   : > { %584 = vmatpush1.bf16.msra.mxu1 %v1580_v16 }
  0x90   : > { %585 = vmatprep.subr.bf16.mxu1 %v1583_v17 }
  0x91   : > { %545 = vmatpush1.bf16.msra.mxu0 %v1572_v13 }
  0x92   : > { %546 = vmatprep.subr.bf16.mxu0 %v1574_v14 }
  0x93   : > { %586 = vmatpush1.bf16.msra.mxu1 %v1592_v20 }
  0x94   : > { %587 = vmatprep.subr.bf16.mxu1 %v1595_v21 }
  0x95   : > { %547 = vmatpush1.bf16.msra.mxu0 %v1586_v18 }
  0x96   : > { %548 = vmatprep.subr.bf16.mxu0 %v1589_v19 }
  0x97   : > { %588 = vmatpush1.bf16.msra.mxu1 %v1606_v25 }
  0x98   : > { %589 = vmatprep.subr.bf16.mxu1 %v1609_v27 }
  0x99   : > { %549 = vmatpush1.bf16.msra.mxu0 %v1598_v22 }
  0x9a   : > { %550 = vmatprep.subr.bf16.mxu0 %v1601_v23 }
  0x9b   : > { %590 = vmatpush1.bf16.msra.mxu1 %v1626_v32 }
  0x9c   : > { %591 = vmatprep.subr.bf16.mxu1 %v1629_v33 }
  0x9d   : > { %551 = vmatpush1.bf16.msra.mxu0 %v1618_v29 }
  0x9e   : > { %552 = vmatprep.subr.bf16.mxu0 %v1623_v31 }
  0x9f   : > { %592 = vmatpush1.bf16.msra.mxu1 %v1639_v37 }
  0xa0   : > { %593 = vmatprep.subr.bf16.mxu1 %v1642_v38 }
  0xa1   : > { %553 = vmatpush1.bf16.msra.mxu0 %v1633_v35 }
  0xa2   : > { %666 = vmatprep.subr.bf16.mxu0 %v1537_v1 }
  0xa3   : > { %594 = vmatpush1.bf16.msra.mxu1 %v1648_v40 }
  0xa4   : > { %707 = vmatprep.subr.bf16.mxu1 %v1554_v7 }
 0x157   : > { %v445_v44 = vpop.f32.mrb[0].mxu0 }
 0x158   : > { %v493_v46 = vadd.f32 %v445_v44, %v246_v42  ;;  %v447_v47 = vpop.f32.mrb[1].mxu0  ;;  %v526_v42 = vpop.permute.xlu0 %525 }
 0x159   : > { %v494_v48 = vadd.f32 %v447_v47, %v247_v43  ;;  %v449_v49 = vpop.f32.mrb[2].mxu0  ;;  %v486_v54 = vpop.f32.mrb[0].mxu1  ;;  %vm527_vm2 = vcmp.eq.s32.totalorder %v526_v42, 1 }
 0x15a   : > { %v1035_v50 = vmul.f32 -1.442695, %v493_v46  ;;  %v450_v51 = vpop.f32.mrb[3].mxu0  ;;  %v488_v55 = vpop.f32.mrb[1].mxu1  ;;  %v495_v61 = vadd.f32 %v486_v54, %v248_v58 }
 0x15b   : > { %v1036_v53 = vmul.f32 -1.442695, %v494_v48  ;;  %v496_v56 = vadd.f32 %v488_v55, %v249_v52  ;;  %v490_v57 = vpop.f32.mrb[2].mxu1 }
 0x15c   : > { %1171 = vpow2.f32 %v1035_v50  ;;  %v491_v59 = vpop.f32.mrb[3].mxu1 }
 0x15d   : > { %1173 = vpow2.f32 %v1036_v53  ;;  %v1037_v60 = vmul.f32 -1.442695, %v496_v56  ;;  %v905_v53 = vstv %s904_s27  ;;  %v1038_v56 = vld [vmem:[%s1521_s24 + $0x10] sm:$0xff] }
 0x15e   : > { %vm906_vm4 = vcmp.lt.s32.totalorder %v905_v53, %v1614_v28  ;;  %v533_v57 = vunpack.c.l.bf16 %v1038_v56 }
 0x15f   : > { %1175 = vpow2.f32 %v1037_v60  ;;  %v907_v55 = vsel %vm906_vm4, 1, %v1368_v3  ;;  %v1039_v60 = vld [vmem:[%s1521_s24 + $0x18] sm:$0xff] }
 0x160   : > { %1177 = vtanh.f32 %v495_v61  ;;  %v535_v42 = vunpack.c.l.bf16 %v1039_v60 }
 0x166   : > { %v1172_v62 = vpop.eup %1171 }
 0x167   : > { %v1174_v63 = vpop.eup %1173  ;;  %v500_v0 = vadd.f32 1.0, %v1172_v62 }
 0x168   : > { %v506_v24 = vadd.f32 1.0, %v1174_v63 }
 0x169   : > { %1179 = vrcp.f32 %v500_v0  ;;  %v1176_v26 = vpop.eup %1175 }
 0x16a   : > { %1181 = vrcp.f32 %v506_v24  ;;  %v1178_v30 = vpop.eup %1177  ;;  %v513_v41 = vadd.f32 1.0, %v1176_v26 }
 0x16c   : > { %1183 = vrcp.f32 %v513_v41 }
 0x173   : > { %v1180_v39 = vpop.eup %1179 }
 0x174   : > { %v1182_v43 = vpop.eup %1181  ;;  %v517_v44 = vmul.f32 %v1180_v39, %v1178_v30  ;;  %v536_v39 = vunpack.c.h.bf16 %v1039_v60 }
 0x175   : > { %v516_v45 = vmul.f32 %v1182_v43, %v243_v34 }
 0x176   : > { %v1184_v48 = vpop.eup %1183 }
 0x177   : > { %v518_v46 = vadd.f32 %v517_v44, %v516_v45 }
 0x179   : > { %1185 = vtanh.f32 %v518_v46  ;;  %v1690_v47 = vsel %vm527_vm2, %v518_v46, %v243_v34 }
 0x183   : > { %v1186_v49 = vpop.eup %1185 }
 0x184   : > { %v520_v50 = vmul.f32 %v1186_v49, %v1184_v48 }
 0x186   : > { %v1693_v51 = vsel %vm527_vm2, %v520_v50, %v1635_v36  ;;  %v777_v36 = vstv %s776_s28 }
 0x187   : > { %v537_v52 = vpack.c.bf16 %v1693_v51, %v1693_v51  ;;  %vm778_vm3 = vcmp.lt.s32.totalorder %v777_v36, %v1614_v28 }
 0x188   : > { %v779_v54 = vsel %vm778_vm3, 1, %v1368_v3 }
 0x189   : > { %571 = vmatmul.mubr.bf16.vlgmr.msra.gmra.mrb[4].mxu0 %v537_v52  ;;  %612 = vmatmul.mubr.bf16.vlgmr.msra.gmra.mrb[4].mxu1 %v537_v52 }
 0x18a   : > { %667 = vmatpush1.bf16.msra.mxu0 %v1539_v2  ;;  %708 = vmatpush1.bf16.msra.mxu1 %v1556_v8 }
 0x18b   : > { %668 = vmatprep.subr.bf16.mxu0 %v1544_v4  ;;  %709 = vmatprep.subr.bf16.mxu1 %v1566_v11 }
 0x18c   : > { %698 = vmatprep.mubr.bf16.mxu0 %v1368_v3  ;;  %739 = vmatprep.mubr.bf16.mxu1 %v1368_v3 }
 0x18d   : > { %781 = vperm.xlu1 %1122, %v779_v54  }
 0x18e   : > { %669 = vmatpush1.bf16.msra.mxu0 %v1548_v5  ;;  %710 = vmatpush1.bf16.msra.mxu1 %v1568_v12 }
 0x18f   : > { %670 = vmatprep.subr.bf16.mxu0 %v1552_v6  ;;  %711 = vmatprep.subr.bf16.mxu1 %v1576_v15 }
 0x191   : > { %909 = vperm.xlu1 %1122, %v907_v55  }
 0x192   : > { %671 = vmatpush1.bf16.msra.mxu0 %v1559_v9  ;;  %712 = vmatpush1.bf16.msra.mxu1 %v1580_v16 }
 0x193   : > { %672 = vmatprep.subr.bf16.mxu0 %v1563_v10  ;;  %713 = vmatprep.subr.bf16.mxu1 %v1583_v17 }
 0x196   : > { %673 = vmatpush1.bf16.msra.mxu0 %v1572_v13  ;;  %714 = vmatpush1.bf16.msra.mxu1 %v1592_v20 }
 0x197   : > { %674 = vmatprep.subr.bf16.mxu0 %v1574_v14  ;;  %715 = vmatprep.subr.bf16.mxu1 %v1595_v21 }
 0x19a   : > { %675 = vmatpush1.bf16.msra.mxu0 %v1586_v18  ;;  %716 = vmatpush1.bf16.msra.mxu1 %v1606_v25 }
 0x19b   : > { %676 = vmatprep.subr.bf16.mxu0 %v1589_v19  ;;  %717 = vmatprep.subr.bf16.mxu1 %v1609_v27 }
 0x19e   : > { %677 = vmatpush1.bf16.msra.mxu0 %v1598_v22  ;;  %718 = vmatpush1.bf16.msra.mxu1 %v1626_v32 }
 0x19f   : > { %678 = vmatprep.subr.bf16.mxu0 %v1601_v23  ;;  %719 = vmatprep.subr.bf16.mxu1 %v1629_v33 }
 0x1a2   : > { %679 = vmatpush1.bf16.msra.mxu0 %v1618_v29  ;;  %720 = vmatpush1.bf16.msra.mxu1 %v1639_v37 }
 0x1a3   : > { %680 = vmatprep.subr.bf16.mxu0 %v1623_v31  ;;  %721 = vmatprep.subr.bf16.mxu1 %v1642_v38 }
 0x1a6   : > { %681 = vmatpush1.bf16.msra.mxu0 %v1633_v35  ;;  %722 = vmatpush1.bf16.msra.mxu1 %v1648_v40 }
 0x1a7   : > { %794 = vmatprep.subr.bf16.mxu0 %v1537_v1  ;;  %835 = vmatprep.subr.bf16.mxu1 %v1554_v7  ;;  %v534_v1 = vunpack.c.h.bf16 %v1038_v56  ;;  %v654_v56 = vpop.permute.xlu0 %653 }
 0x1a8   : > { %vm655_vm5 = vcmp.eq.s32.totalorder %v654_v56, 1 }
 0x25c   : > { %v572_v58 = vpop.f32.mrb[4].mxu0  ;;  %v613_v7 = vpop.f32.mrb[4].mxu1 }
 0x25d   : > { %v620_v59 = vadd.f32 %v572_v58, %v533_v57  ;;  %v574_v61 = vpop.f32.mrb[5].mxu0  ;;  %v615_v62 = vpop.f32.mrb[5].mxu1  ;;  %v622_v44 = vadd.f32 %v613_v7, %v535_v42 }
 0x25e   : > { %v621_v63 = vadd.f32 %v574_v61, %v534_v1  ;;  %v576_v0 = vpop.f32.mrb[6].mxu0  ;;  %v617_v24 = vpop.f32.mrb[6].mxu1  ;;  %v623_v41 = vadd.f32 %v615_v62, %v536_v39  ;;  %v1048_v39 = vld [vmem:[%s1521_s24 + $0x30] sm:$0xff] }
 0x25f   : > { %v1040_v26 = vmul.f32 -1.442695, %v620_v59  ;;  %v577_v28 = vpop.f32.mrb[7].mxu0  ;;  %v618_v30 = vpop.f32.mrb[7].mxu1  ;;  %v790_v42 = vunpack.c.h.bf16 %v1048_v39 }
 0x260   : > { %v1041_v34 = vmul.f32 -1.442695, %v621_v63  ;;  %v1042_v43 = vmul.f32 -1.442695, %v623_v41  ;;  %v789_v41 = vunpack.c.l.bf16 %v1048_v39 }
 0x261   : > { %1187 = vpow2.f32 %v1040_v26 }
 0x262   : > { %1189 = vpow2.f32 %v1041_v34 }
 0x263   : > { %1191 = vpow2.f32 %v1042_v43 }
 0x264   : > { %1193 = vtanh.f32 %v622_v44 }
 0x26b   : > { %v1188_v45 = vpop.eup %1187 }
 0x26c   : > { %v1190_v46 = vpop.eup %1189  ;;  %v627_v48 = vadd.f32 1.0, %v1188_v45 }
 0x26d   : > { %v633_v49 = vadd.f32 1.0, %v1190_v46  ;;  %v1192_v50 = vpop.eup %1191  ;;  %v1049_v46 = vld [vmem:[%s1521_s24 + $0x38] sm:$0xff] }
 0x26e   : > { %1195 = vrcp.f32 %v627_v48  ;;  %v1194_v52 = vpop.eup %1193  ;;  %v640_v55 = vadd.f32 1.0, %v1192_v50 }
 0x26f   : > { %1197 = vrcp.f32 %v633_v49 }
 0x270   : > { %1199 = vrcp.f32 %v640_v55 }
 0x278   : > { %v1196_v36 = vpop.eup %1195 }
 0x279   : > { %v1198_v53 = vpop.eup %1197  ;;  %v644_v54 = vmul.f32 %v1196_v36, %v1194_v52 }
 0x27a   : > { %v643_v57 = vmul.f32 %v1198_v53, %v1690_v47  ;;  %v1200_v7 = vpop.eup %1199 }
 0x27c   : > { %v645_v1 = vadd.f32 %v644_v54, %v643_v57  ;;  %v792_v57 = vunpack.c.h.bf16 %v1049_v46 }
 0x27e   : > { %1201 = vtanh.f32 %v645_v1  ;;  %v1741_v58 = vsel %vm655_vm5, %v645_v1, %v1690_v47 }
 0x288   : > { %v1202_v59 = vpop.eup %1201 }
 0x289   : > { %v647_v60 = vmul.f32 %v1202_v59, %v1200_v7 }
 0x28b   : > { %v1744_v61 = vsel %vm655_vm5, %v647_v60, %v1693_v51 }
 0x28c   : > { %v665_v62 = vpack.c.bf16 %v1744_v61, %v1744_v61 }
 0x28e   : > { %699 = vmatmul.mubr.bf16.vlgmr.msra.gmra.mrb[8].mxu0 %v665_v62  ;;  %740 = vmatmul.mubr.bf16.vlgmr.msra.gmra.mrb[8].mxu1 %v665_v62 }
 0x28f   : > { %795 = vmatpush1.bf16.msra.mxu0 %v1539_v2  ;;  %836 = vmatpush1.bf16.msra.mxu1 %v1556_v8  ;;  %v1043_v2 = vld [vmem:[%s1521_s24 + $0x20] sm:$0xff] }
 0x290   : > { %796 = vmatprep.subr.bf16.mxu0 %v1544_v4  ;;  %837 = vmatprep.subr.bf16.mxu1 %v1566_v11  ;;  %v662_v4 = vunpack.c.h.bf16 %v1043_v2 }
 0x291   : > { %826 = vmatprep.mubr.bf16.mxu0 %v1368_v3  ;;  %867 = vmatprep.mubr.bf16.mxu1 %v1368_v3  ;;  %v661_v3 = vunpack.c.l.bf16 %v1043_v2 }
 0x293   : > { %797 = vmatpush1.bf16.msra.mxu0 %v1548_v5  ;;  %838 = vmatpush1.bf16.msra.mxu1 %v1568_v12 }
 0x294   : > { %798 = vmatprep.subr.bf16.mxu0 %v1552_v6  ;;  %839 = vmatprep.subr.bf16.mxu1 %v1576_v15 }
 0x297   : > { %799 = vmatpush1.bf16.msra.mxu0 %v1559_v9  ;;  %840 = vmatpush1.bf16.msra.mxu1 %v1580_v16  ;;  %v1044_v9 = vld [vmem:[%s1521_s24 + $0x28] sm:$0xff] }
 0x298   : > { %800 = vmatprep.subr.bf16.mxu0 %v1563_v10  ;;  %841 = vmatprep.subr.bf16.mxu1 %v1583_v17 }
 0x29b   : > { %801 = vmatpush1.bf16.msra.mxu0 %v1572_v13  ;;  %842 = vmatpush1.bf16.msra.mxu1 %v1592_v20 }
 0x29c   : > { %802 = vmatprep.subr.bf16.mxu0 %v1574_v14  ;;  %843 = vmatprep.subr.bf16.mxu1 %v1595_v21  ;;  %v663_v21 = vunpack.c.l.bf16 %v1044_v9 }
 0x29f   : > { %803 = vmatpush1.bf16.msra.mxu0 %v1586_v18  ;;  %844 = vmatpush1.bf16.msra.mxu1 %v1606_v25 }
 0x2a0   : > { %804 = vmatprep.subr.bf16.mxu0 %v1589_v19  ;;  %845 = vmatprep.subr.bf16.mxu1 %v1609_v27  ;;  %v664_v19 = vunpack.c.h.bf16 %v1044_v9 }
 0x2a3   : > { %805 = vmatpush1.bf16.msra.mxu0 %v1598_v22  ;;  %846 = vmatpush1.bf16.msra.mxu1 %v1626_v32 }
 0x2a4   : > { %806 = vmatprep.subr.bf16.mxu0 %v1601_v23  ;;  %847 = vmatprep.subr.bf16.mxu1 %v1629_v33 }
 0x2a7   : > { %807 = vmatpush1.bf16.msra.mxu0 %v1618_v29  ;;  %848 = vmatpush1.bf16.msra.mxu1 %v1639_v37  ;;  %v782_v37 = vpop.permute.xlu1 %781 }
 0x2a8   : > { %808 = vmatprep.subr.bf16.mxu0 %v1623_v31  ;;  %849 = vmatprep.subr.bf16.mxu1 %v1642_v38  ;;  %vm783_vm6 = vcmp.eq.s32.totalorder %v782_v37, 1 }
 0x2ab   : > { %809 = vmatpush1.bf16.msra.mxu0 %v1633_v35  ;;  %850 = vmatpush1.bf16.msra.mxu1 %v1648_v40 }
 0x361   : > { %v700_v5 = vpop.f32.mrb[8].mxu0  ;;  %v741_v6 = vpop.f32.mrb[8].mxu1 }
 0x362   : > { %v748_v8 = vadd.f32 %v700_v5, %v661_v3  ;;  %v702_v10 = vpop.f32.mrb[9].mxu0  ;;  %v743_v11 = vpop.f32.mrb[9].mxu1  ;;  %v750_v23 = vadd.f32 %v741_v6, %v663_v21 }
 0x363   : > { %v749_v12 = vadd.f32 %v702_v10, %v662_v4  ;;  %v704_v13 = vpop.f32.mrb[10].mxu0  ;;  %v745_v14 = vpop.f32.mrb[10].mxu1  ;;  %v751_v20 = vadd.f32 %v743_v11, %v664_v19 }
 0x364   : > { %v1045_v15 = vmul.f32 -1.442695, %v748_v8  ;;  %v705_v16 = vpop.f32.mrb[11].mxu0  ;;  %v746_v17 = vpop.f32.mrb[11].mxu1 }
 0x365   : > { %v1046_v18 = vmul.f32 -1.442695, %v749_v12  ;;  %v1047_v22 = vmul.f32 -1.442695, %v751_v20  ;;  %v910_v10 = vpop.permute.xlu1 %909 }
 0x366   : > { %1203 = vpow2.f32 %v1045_v15  ;;  %vm911_vm7 = vcmp.eq.s32.totalorder %v910_v10, 1 }
 0x367   : > { %1205 = vpow2.f32 %v1046_v18 }
 0x368   : > { %1207 = vpow2.f32 %v1047_v22 }
 0x369   : > { %1209 = vtanh.f32 %v750_v23 }
 0x370   : > { %v1204_v25 = vpop.eup %1203 }
 0x371   : > { %v1206_v27 = vpop.eup %1205  ;;  %v755_v29 = vadd.f32 1.0, %v1204_v25 }
 0x372   : > { %v761_v31 = vadd.f32 1.0, %v1206_v27  ;;  %v1208_v32 = vpop.eup %1207 }
 0x373   : > { %1211 = vrcp.f32 %v755_v29  ;;  %v1210_v33 = vpop.eup %1209  ;;  %v768_v40 = vadd.f32 1.0, %v1208_v32 }
 0x374   : > { %1213 = vrcp.f32 %v761_v31 }
 0x375   : > { %1215 = vrcp.f32 %v768_v40 }
 0x37d   : > { %v1212_v35 = vpop.eup %1211 }
 0x37e   : > { %v1214_v38 = vpop.eup %1213  ;;  %v772_v47 = vmul.f32 %v1212_v35, %v1210_v33 }
 0x37f   : > { %v771_v51 = vmul.f32 %v1214_v38, %v1741_v58  ;;  %v1216_v24 = vpop.eup %1215 }
 0x381   : > { %v773_v63 = vadd.f32 %v772_v47, %v771_v51 }
 0x383   : > { %1217 = vtanh.f32 %v773_v63  ;;  %v785_v0 = vsel %vm783_vm6, %v773_v63, %v1741_v58  ;;  %v791_v58 = vunpack.c.l.bf16 %v1049_v46 }
 0x38d   : > { %v1218_v26 = vpop.eup %1217 }
 0x38e   : > { %v775_v28 = vmul.f32 %v1218_v26, %v1216_v24 }
 0x390   : > { %v784_v30 = vsel %vm783_vm6, %v775_v28, %v1744_v61 }
 0x391   : > { %v793_v34 = vpack.c.bf16 %v784_v30, %v784_v30 }
 0x393   : > { %827 = vmatmul.mubr.bf16.vlgmr.msra.gmra.mrb[12].mxu0 %v793_v34  ;;  %868 = vmatmul.mubr.bf16.vlgmr.msra.gmra.mrb[12].mxu1 %v793_v34 }
 0x466   : > { %v828_v43 = vpop.f32.mrb[12].mxu0  ;;  %v869_v44 = vpop.f32.mrb[12].mxu1 }
 0x467   : > { %v876_v45 = vadd.f32 %v828_v43, %v789_v41  ;;  %v830_v48 = vpop.f32.mrb[13].mxu0  ;;  %v871_v49 = vpop.f32.mrb[13].mxu1  ;;  %v878_v59 = vadd.f32 %v869_v44, %v791_v58 }
 0x468   : > { %v877_v50 = vadd.f32 %v830_v48, %v790_v42  ;;  %v832_v52 = vpop.f32.mrb[14].mxu0  ;;  %v873_v36 = vpop.f32.mrb[14].mxu1  ;;  %v879_v1 = vadd.f32 %v871_v49, %v792_v57 }
 0x469   : > { %v1050_v53 = vmul.f32 -1.442695, %v876_v45  ;;  %v833_v54 = vpop.f32.mrb[15].mxu0  ;;  %v874_v55 = vpop.f32.mrb[15].mxu1 }
 0x46a   : > { %v1051_v56 = vmul.f32 -1.442695, %v877_v50  ;;  %v1052_v7 = vmul.f32 -1.442695, %v879_v1 }
 0x46b   : > { %1219 = vpow2.f32 %v1050_v53 }
 0x46c   : > { %1221 = vpow2.f32 %v1051_v56 }
 0x46d   : > { %1223 = vpow2.f32 %v1052_v7 }
 0x46e   : > { %1225 = vtanh.f32 %v878_v59 }
 0x475   : > { %v1220_v60 = vpop.eup %1219 }
 0x476   : > { %v1222_v61 = vpop.eup %1221  ;;  %v883_v62 = vadd.f32 1.0, %v1220_v60 }
 0x477   : > { %v889_v2 = vadd.f32 1.0, %v1222_v61  ;;  %v1224_v3 = vpop.eup %1223 }
 0x478   : > { %1227 = vrcp.f32 %v883_v62  ;;  %v1226_v4 = vpop.eup %1225  ;;  %v896_v9 = vadd.f32 1.0, %v1224_v3 }
 0x479   : > { %1229 = vrcp.f32 %v889_v2 }
 0x47a   : > { %1231 = vrcp.f32 %v896_v9 }
 0x482   : > { %v1228_v5 = vpop.eup %1227 }
 0x483   : > { %v1230_v6 = vpop.eup %1229  ;;  %v900_v8 = vmul.f32 %v1228_v5, %v1226_v4 }
 0x484   : > { %v899_v11 = vmul.f32 %v1230_v6, %v785_v0  ;;  %v1232_v14 = vpop.eup %1231 }
 0x486   : > { %v901_v12 = vadd.f32 %v900_v8, %v899_v11 }
 0x488   : > { %1233 = vtanh.f32 %v901_v12  ;;  %v913_v13 = vsel %vm911_vm7, %v901_v12, %v785_v0 }
 0x489   : > { %915 = vst [vmem:[#allocation3] sm:$0xff] %v913_v13 }
 0x492   : > { %v1234_v15 = vpop.eup %1233 }
 0x493   : > { %v903_v16 = vmul.f32 %v1234_v15, %v1232_v14 }
 0x495   : > { %v912_v17 = vsel %vm911_vm7, %v903_v16, %v784_v30 }
 0x496   : > { %914 = vst [vmem:[#allocation2] sm:$0xff] %v912_v17 }
 0x497 PF: > { %p1053_p4 = scmp.ne.s32.totalorder %s1417_s0, 2 }
 0x499   : > { %919 = sbr.rel (%p1053_p4) target bundleno = 1184 (0x4a0), region = 52 }
 0x49d   : > { %v920_v18 = vld [vmem:[#allocation2] sm:$0xff] (!%p1053_p4) }
 0x49e   : > { %921 = vst [vmem:[#allocation11] sm:$0xff] (!%p1053_p4), %v920_v18 }
 0x4a0 PF: > { %p1081_p5 = scmp.eq.s32.totalorder %s1417_s0, 2  ;;  %s1369_s20 = smov [#allocation11]  }
 0x4a1   : > { %s929_s5 = sshll.u32 %s1369_s20, 4  ;;  %s930_s5 = int_to_ptr.vmem [resolvable:$true] %s929_s5 }
 0x4a2   : > { %s1293_s6 = scalar_lea.vmem %s930_s5, 128  ;;  %p1300_p12 = scmp.lt.s32.totalorder %s930_s5, %s930_s5 }
 0x4a3   : > { %p1294_p6 = scmp.ne.s32.totalorder %s930_s5, %s1293_s6  ;;  %p1301_p0 = scmp.lt.s32.totalorder %s1293_s6, %s1293_s6 }
 0x4a5   : > { %p1295_p9 = pnand %p1294_p6, %p1081_p5  ;;  %p1302_p2 = por %p1301_p0, %p1300_p12 }
 0x4a7   : > { %p1296_p10 = pneg %p1295_p9 }
 0x4a9   : > { %p1303_p11 = pnand %p1302_p2, %p1296_p10 }
 0x4ab   : > { %1306 = shalt.err (!%p1303_p11)
}
 0x4ac   : > { %s1307_s9 = scalar_lea.hbm %s1828_s4, 128 }
 0x4ad   : > { %p1308_p13 = scmp.ne.s32.totalorder %s1828_s4, %s1307_s9  ;;  %p1313_p7 = scmp.lt.u32.totalorder %s1307_s9, %s1828_s4 }
 0x4af   : > { %p1309_p3 = pnand %p1308_p13, %p1081_p5 }
 0x4b1   : > { %p1310_p8 = pneg %p1309_p3 }
 0x4b3   : > { %p1315_p1 = pnand %p1313_p7, %p1310_p8 }
 0x4b5   : > { %1318 = shalt.err (!%p1315_p1)
}
 0x4b6   : > { %1067 = dma.vmem_to_hbm [thread:$0]  (%p1081_p5), %s930_s5, 128, %s1828_s4, [#allocation8]  }
 0x4b7   : > { %1344 = dma.done.wait (%p1081_p5), [#allocation8], 128  }
 0x4b8   : > { %1346 = vsyncadd (%p1081_p5), [#allocation8], 4294967168 }
 0x4b9 PF: > { %p17_p4 = scmp.ge.s32.totalorder %s1443_s26, 5   ;;  %s1841_s17 = smov %s1353_s18 }
 0x4ba   : > { %s1842_s18 = smov %s1357_s19  ;;  %s1843_s19 = smov %s1472_s15 }
 0x4bb   : > { %s1844_s20 = smov %s1443_s26  ;;  %19 = sbr.rel (!%p17_p4) target bundleno = 7 (0x7), region = 88 }
 0x4c2   :  { %942 = vsyncpa [#allocation7], 1 }
 0x4c3   :  { %944 = vsyncpa [#allocation7 + $0x1], 1 }
 0x4c4   :  { %945 = vsyncpa [#allocation10], 1 }
 0x4c5   :  { %946 = vsyncpa [#allocation8], 1 }
 0x4c6   :  { %948 = vsyncpa [#allocation8 + $0x1], 1 }

</bundles_post_ra>
